<compile_context>
chip_gen: v7x
topology: tpu7x:2x2x1
jax: 0.10.0
libtpu: 0.0.40
codegen_flags: <defaults>
</compile_context>

<pallas_src>
import functools

import numpy as np
import jax
import jax.numpy as jnp
from jax.experimental import pallas as pl
from jax.experimental.pallas import tpu as pltpu


# Flip to jnp.bfloat16 on v6e/v7x production for ~2x MXU throughput (f32
# accumulation kept via preferred_element_type); left at f32 here so the
# forward matches the PyTorch reference numerics exactly.
_MXU_DTYPE = jnp.float32
# Explicit scoped-VMEM budget (v5e default is only 16 MiB of 128; v6e/v7x 32).
_VMEM_LIMIT = 32 * 1024 * 1024
_LANE = 128


def _mxu(x):
    return x if _MXU_DTYPE == jnp.float32 else x.astype(_MXU_DTYPE)


def _row_blocks(n, max_tile=256):
    """Pick a row-tile (multiple of 8 when possible) and padded row count."""
    if n <= 8:
        return n, n                       # single full block (== full extent)
    tile = 8 if n <= 64 else min(max_tile, (n // 8) * 8)
    n_pad = pl.cdiv(n, tile) * tile
    return tile, n_pad


def _pad_rows(x, n_pad):
    n = x.shape[0]
    if n == n_pad:
        return x
    return jnp.pad(x, ((0, n_pad - n),) + ((0, 0),) * (x.ndim - 1))


# ----------------------------- Pallas kernels ------------------------------

def _visit_emb_kernel(idx_ref, cm_ref, emb_ref, o_ref, acc_ref, *,
                      num_codes, v_tile):
    # idx: (tn, C) int32, cm: (tn, C) f32, emb: (v_tile, E) — V-tile reduction.
    # o[n] = tanh(sum_c cm[n,c] * emb[idx[n,c]]) realized as a dense one-hot
    # slab per V tile + one MXU matmul, accumulated over V tiles.
    k = pl.program_id(1)

    @pl.when(k == 0)
    def _():
        acc_ref[...] = jnp.zeros_like(acc_ref)

    idx = idx_ref[...]
    cm = cm_ref[...]
    n_rows = idx.shape[0]
    lane = jax.lax.broadcasted_iota(jnp.int32, (n_rows, v_tile), 1) + k * v_tile
    dense = jnp.zeros((n_rows, v_tile), jnp.float32)
    for c in range(num_codes):                       # static, C is tiny
        dense = dense + jnp.where(lane == idx[:, c:c + 1], cm[:, c:c + 1], 0.0)
    acc_ref[...] += jnp.dot(_mxu(dense), _mxu(emb_ref[...]),
                            preferred_element_type=jnp.float32)

    @pl.when(k == pl.num_programs(1) - 1)
    def _():
        o_ref[...] = jnp.tanh(acc_ref[...])


def visit_embeddings(emb_table, x_idx, code_mask):
    # emb_table: (V, E); x_idx: (T, B, C) int32; code_mask: (T, B, C) f32
    # TODO(synk): for huge V a scalar-prefetch DMA gather of the C rows per
    # visit avoids the O(N*V*E) one-hot matmul entirely.
    T, B, C = x_idx.shape
    V, E = emb_table.shape
    N = T * B
    tn, n_pad = _row_blocks(N)
    v_tile = min(V, 512)
    v_pad = pl.cdiv(V, v_tile) * v_tile
    idx = _pad_rows(x_idx.reshape(N, C).astype(jnp.int32), n_pad)
    cm = _pad_rows(code_mask.reshape(N, C).astype(jnp.float32), n_pad)
    emb = emb_table if v_pad == V else jnp.pad(emb_table,
                                               ((0, v_pad - V), (0, 0)))
    out = pl.pallas_call(
        functools.partial(_visit_emb_kernel, num_codes=C, v_tile=v_tile),
        out_shape=jax.ShapeDtypeStruct((n_pad, E), jnp.float32),
        grid_spec=pltpu.PrefetchScalarGridSpec(
            num_scalar_prefetch=0,
            grid=(n_pad // tn, v_pad // v_tile),
            in_specs=[pl.BlockSpec((tn, C), lambda i, k: (i, 0)),
                      pl.BlockSpec((tn, C), lambda i, k: (i, 0)),
                      pl.BlockSpec((v_tile, E), lambda i, k: (k, 0))],
            out_specs=pl.BlockSpec((tn, E), lambda i, k: (i, 0)),
            scratch_shapes=[pltpu.VMEM((tn, E), jnp.float32)]),
        compiler_params=pltpu.CompilerParams(
            dimension_semantics=("parallel", "arbitrary"),
            vmem_limit_bytes=_VMEM_LIMIT),
    )(idx, cm, emb)
    return out[:N].reshape(T, B, E)


def _bigru_kernel(*refs, seq_len, batch, hidden, num_x):
    # x slabs: (T*B, D_i); wih slabs: (D_i, 6H) = [fwd r|z|n , bwd r|z|n];
    # whh: (H, 3H) fwd.  Output o: (T*B, OUT_W) 128-lane-padded, lanes
    # [0:H] = forward hidden at t, [H:2H] = one backward step from zero state.
    x_refs = refs[:num_x]
    wih_refs = refs[num_x:2 * num_x]
    bih_ref, whh_ref, bhf_ref, bhb_ref, o_ref = refs[2 * num_x:]
    H = hidden
    N = seq_len * batch

    # Fused fwd+bwd input projections, summed over the (row-split) input slabs
    # -> avoids an HBM-materialized concat of x_emb_diag / x_emb_proc.
    gi = bih_ref[...]
    for x_ref, wih_ref in zip(x_refs, wih_refs):
        gi = gi + jnp.dot(_mxu(x_ref[...]), _mxu(wih_ref[...]),
                          preferred_element_type=jnp.float32)
    gif = gi[:, 0:3 * H]
    gib = gi[:, 3 * H:6 * H]

    # Backward half of the prefix bi-GRU at position t is exactly one backward
    # GRU step on x[t] from a zero hidden state -> fully batched, no recurrence.
    bb = bhb_ref[...]
    rb = jax.nn.sigmoid(gib[:, 0:H] + bb[:, 0:H])
    zb = jax.nn.sigmoid(gib[:, H:2 * H] + bb[:, H:2 * H])
    nb = jnp.tanh(gib[:, 2 * H:3 * H] + rb * bb[:, 2 * H:3 * H])
    o_ref[:, H:2 * H] = (1.0 - zb) * nb

    # Zero the lane padding once (output block is 128-lane-dense overall).
    pad = o_ref.shape[1] - 2 * H
    if pad > 0:
        o_ref[:, 2 * H:] = jnp.zeros((N, pad), jnp.float32)

    # Forward recurrence: only the tiny (B,H)x(H,3H) matmul + VPU gates / step.
    # TODO(synk): for large T switch to lax.fori_loop(..., unroll=8) and stage
    # the per-step states into a stacked value for a single lane-dense slab
    # store instead of per-step partial stores.
    whh = whh_ref[...]
    bhf = bhf_ref[...]
    h = jnp.zeros((batch, H), jnp.float32)
    for t in range(seq_len):                         # static unroll (small T)
        g = gif[t * batch:(t + 1) * batch, :]
        gh = jnp.dot(_mxu(h), _mxu(whh), preferred_element_type=jnp.float32) + bhf
        r = jax.nn.sigmoid(g[:, 0:H] + gh[:, 0:H])
        z = jax.nn.sigmoid(g[:, H:2 * H] + gh[:, H:2 * H])
        n = jnp.tanh(g[:, 2 * H:3 * H] + r * gh[:, 2 * H:3 * H])
        h = (1.0 - z) * n + z * h
        o_ref[t * batch:(t + 1) * batch, 0:H] = h


def bigru_prefix(xs, gp):
    # xs: (T, B, D) array, or list of slabs that are logically concatenated
    # along the feature dim.  Reproduces the reference loop
    #   for i: hd, _ = biGRU(x[0:i+1]); hidden[i] = hd[i]      (dropout p = 0)
    # TODO(synk): the sequential recurrence over T forces a single grid step at
    # B=2; for production batch sizes tile over B with a "parallel" grid axis.
    if not isinstance(xs, (list, tuple)):
        xs = [xs]
    T, B, _ = xs[0].shape
    H = gp['whh_f'].shape[0]
    dims = [x.shape[-1] for x in xs]
    offs = np.concatenate([[0], np.cumsum(dims)]).astype(int)
    wih_slabs = [jnp.concatenate([gp['wih_f'][offs[i]:offs[i + 1]],
                                  gp['wih_b'][offs[i]:offs[i + 1]]], axis=1)
                 for i in range(len(xs))]                        # (D_i, 6H)
    bih = jnp.concatenate([gp['bih_f'], gp['bih_b']], axis=1)    # (1, 6H)
    x2 = [x.reshape(T * B, d) for x, d in zip(xs, dims)]
    out_w = max(_LANE, pl.cdiv(2 * H, _LANE) * _LANE)

    in_arrays = x2 + wih_slabs + [bih, gp['whh_f'], gp['bhh_f'], gp['bhh_b']]
    in_specs = [pl.BlockSpec(a.shape, lambda i: (0, 0)) for a in in_arrays]

    out = pl.pallas_call(
        functools.partial(_bigru_kernel, seq_len=T, batch=B, hidden=H,
                          num_x=len(xs)),
        out_shape=jax.ShapeDtypeStruct((T * B, out_w), jnp.float32),
        grid_spec=pltpu.PrefetchScalarGridSpec(
            num_scalar_prefetch=0, grid=(1,),
            in_specs=in_specs,
            out_specs=pl.BlockSpec((T * B, out_w), lambda i: (0, 0))),
        compiler_params=pltpu.CompilerParams(
            dimension_semantics=("arbitrary",),
            vmem_limit_bytes=_VMEM_LIMIT),
    )(*in_arrays)
    return out[:, :2 * H].reshape(T, B, 2 * H)


def _fusion_kernel(xd_ref, xp_ref, hd_ref, hp_ref, hc_ref, md_ref, mp_ref,
                   Wx_ref, Wh_ref, ba_ref, va_ref,
                   Wod_ref, bod_ref, Wy_ref, by_ref,
                   Woph_ref, Wopy_ref, bop_ref,
                   yd_ref, yp_ref):
    hd = hd_ref[...]
    hp = hp_ref[...]
    hc = hc_ref[...]
    Wh = _mxu(Wh_ref[...])
    va = va_ref[...]            # (1, A)

    # W_attention split into [W_x | W_h]: no in-kernel concatenates, and the
    # shared h_cat @ W_h term is computed once for both blends.
    xdWx = jnp.dot(_mxu(xd_ref[...]), _mxu(Wx_ref[...]),
                   preferred_element_type=jnp.float32) + ba_ref[...]
    xpWx = jnp.dot(_mxu(xp_ref[...]), _mxu(Wx_ref[...]),
                   preferred_element_type=jnp.float32) + ba_ref[...]
    hdWh = jnp.dot(_mxu(hd), Wh, preferred_element_type=jnp.float32)
    hpWh = jnp.dot(_mxu(hp), Wh, preferred_element_type=jnp.float32)
    hcWh = jnp.dot(_mxu(hc), Wh, preferred_element_type=jnp.float32)

    def score(pre):
        # (N, A) . v_attention done on VPU/XLU: a 1-lane MXU matvec would use
        # <0.5% of the MXU and pay a full push/drain latency per call.
        return jnp.sum(jnp.tanh(pre) * va, axis=-1, keepdims=True)

    def blend(xWx, hWh_own, h_own):
        s1 = score(xWx + hWh_own)
        s2 = score(xWx + hcWh)
        m = jnp.maximum(s1, s2)
        e1 = jnp.exp(s1 - m)
        e2 = jnp.exp(s2 - m)
        inv = 1.0 / (e1 + e2)                        # exact pair softmax
        return (e1 * inv) * h_own + (e2 * inv) * hc

    # TODO(synk): on v7x pack Wod and Woph into one 256-lane matmul per blend
    # to match the 2x256x256 MXU tile (blocked here by the y_tmp dependency).
    fh_diag = blend(xdWx, hdWh, hd)
    out_diag = jax.nn.sigmoid(
        jnp.dot(_mxu(fh_diag), _mxu(Wod_ref[...]),
                preferred_element_type=jnp.float32) + bod_ref[...])
    y_diag = out_diag * md_ref[...]
    yd_ref[...] = y_diag                             # lane-dense (tn, 128)

    # Wy has zero rows for the padded y_diag columns -> exact reference math.
    y_tmp = jnp.tanh(
        jnp.dot(_mxu(y_diag), _mxu(Wy_ref[...]),
                preferred_element_type=jnp.float32) + by_ref[...])
    fh_proc = blend(xpWx, hpWh, hp)
    out_proc = jax.nn.sigmoid(
        jnp.dot(_mxu(fh_proc), _mxu(Woph_ref[...]),
                preferred_element_type=jnp.float32)
        + jnp.dot(_mxu(y_tmp), _mxu(Wopy_ref[...]),
                  preferred_element_type=jnp.float32)
        + bop_ref[...])
    yp_ref[...] = out_proc * mp_ref[...]


def fusion_outputs(x_emb_diag, x_emb_proc, hidden_diag, hidden_proc, hidden_cat,
                   mask_diag, mask_proc, p):
    T, B, E = x_emb_diag.shape
    N = T * B
    H2 = hidden_diag.shape[-1]
    A = p['W_attention'].shape[1]
    Cd = p['W_output_diag'].shape[1]
    Cp = p['W_output_proc'].shape[1]
    dy = p['W_y'].shape[1]
    Cd_pad = pl.cdiv(Cd, _LANE) * _LANE
    Cp_pad = pl.cdiv(Cp, _LANE) * _LANE
    tn, n_pad = _row_blocks(N)

    # Weight preprocessing (one-time, plain JAX): split concatenation-style
    # weights into halves and zero-pad output heads to lane-dense widths.
    Wx = p['W_attention'][:E]
    Wh = p['W_attention'][E:]
    ba = p['b_attention'].reshape(1, A)
    va = p['v_attention'].reshape(1, A)
    Wod = jnp.pad(p['W_output_diag'], ((0, 0), (0, Cd_pad - Cd)))
    bod = jnp.pad(p['b_output_diag'].reshape(1, Cd), ((0, 0), (0, Cd_pad - Cd)))
    Wy = jnp.pad(p['W_y'], ((0, Cd_pad - Cd), (0, 0)))      # zero rows for pads
    by = p['b_y'].reshape(1, dy)
    Woph = jnp.pad(p['W_output_proc'][:H2], ((0, 0), (0, Cp_pad - Cp)))
    Wopy = jnp.pad(p['W_output_proc'][H2:], ((0, 0), (0, Cp_pad - Cp)))
    bop = jnp.pad(p['b_output_proc'].reshape(1, Cp), ((0, 0), (0, Cp_pad - Cp)))

    data = [_pad_rows(a, n_pad) for a in
            (x_emb_diag.reshape(N, E), x_emb_proc.reshape(N, E),
             hidden_diag.reshape(N, H2), hidden_proc.reshape(N, H2),
             hidden_cat.reshape(N, H2),
             mask_diag.reshape(N, 1), mask_proc.reshape(N, 1))]
    wts = [Wx, Wh, ba, va, Wod, bod, Wy, by, Woph, Wopy, bop]

    def row_spec(a):
        return pl.BlockSpec((tn, a.shape[1]), lambda i: (i, 0))

    def full_spec(a):
        return pl.BlockSpec(a.shape, lambda i: (0, 0))

    in_specs = [row_spec(a) for a in data] + [full_spec(w) for w in wts]

    yd_p, yp_p = pl.pallas_call(
        _fusion_kernel,
        out_shape=(jax.ShapeDtypeStruct((n_pad, Cd_pad), jnp.float32),
                   jax.ShapeDtypeStruct((n_pad, Cp_pad), jnp.float32)),
        grid_spec=pltpu.PrefetchScalarGridSpec(
            num_scalar_prefetch=0, grid=(n_pad // tn,),
            in_specs=in_specs,
            out_specs=[pl.BlockSpec((tn, Cd_pad), lambda i: (i, 0)),
                       pl.BlockSpec((tn, Cp_pad), lambda i: (i, 0))]),
        compiler_params=pltpu.CompilerParams(
            dimension_semantics=("parallel",),
            vmem_limit_bytes=_VMEM_LIMIT),
    )(*data, *wts)
    return (yd_p[:N, :Cd].reshape(T, B, Cd),
            yp_p[:N, :Cp].reshape(T, B, Cp))


def _rematrix_kernel(a_ref, b_ref, o_ref, *, n_valid, tile_rows):
    # NT contraction on E (no host-side transpose of b) + row normalization.
    re = jax.lax.dot_general(_mxu(a_ref[...]), _mxu(b_ref[...]),
                             dimension_numbers=(((1,), (1,)), ((), ())),
                             preferred_element_type=jnp.float32)
    denom = jnp.sum(re, axis=1, keepdims=True)
    # Guard only the zero-padded rows (row >= n_valid); real rows keep the
    # reference's raw row-sum division (no epsilon).
    row = pl.program_id(0) * tile_rows + jax.lax.broadcasted_iota(
        jnp.int32, (tile_rows, 1), 0)
    denom = jnp.where(row < n_valid, denom, 1.0)
    o_ref[...] = re / denom


def re_matrix(a, b):
    # a: (Nd, E), b: (Np, E) -> row-normalized a @ b.T, tiled over Nd rows,
    # Np zero-padded to 128 lanes for lane-dense stores.
    # TODO(synk): for production vocab sizes also tile Np (two-pass row sum).
    Nd, E = a.shape
    Np = b.shape[0]
    Np_pad = pl.cdiv(Np, _LANE) * _LANE
    tn, nd_pad = _row_blocks(Nd)
    a_p = _pad_rows(a, nd_pad)
    b_p = jnp.pad(b, ((0, Np_pad - Np), (0, 0)))
    out = pl.pallas_call(
        functools.partial(_rematrix_kernel, n_valid=Nd, tile_rows=tn),
        out_shape=jax.ShapeDtypeStruct((nd_pad, Np_pad), jnp.float32),
        grid_spec=pltpu.PrefetchScalarGridSpec(
            num_scalar_prefetch=0, grid=(nd_pad // tn,),
            in_specs=[pl.BlockSpec((tn, E), lambda i: (i, 0)),
                      pl.BlockSpec((Np_pad, E), lambda i: (0, 0))],
            out_specs=pl.BlockSpec((tn, Np_pad), lambda i: (i, 0))),
        compiler_params=pltpu.CompilerParams(
            dimension_semantics=("parallel",),
            vmem_limit_bytes=_VMEM_LIMIT),
    )(a_p, b_p)
    return out[:Nd, :Np]


# --------------------- ontology attention (plain JAX glue) ------------------
# TODO(synk): the reference indexes/scatters with 3-D numpy index arrays
# (node[:, :, 0] etc.) whose broadcast semantics are data-dependent; here the
# intended GRAM-style semantics are realized with 2-D (G, L) index matrices
# where row g repeats its single update-target id.

def leaf_attention(emb, nodes, neighbors, masks, weights, W, b, v):
    orig = emb                     # node lookups read the original table
    cur = emb                      # running (cloned) table
    for node, neighbor, mask, weight in zip(nodes, neighbors, masks, weights):
        node_tmp = orig[node]              # (G, L, E)
        neighbor_tmp = cur[neighbor]       # (G, L, E)
        att_in = jnp.concatenate([node_tmp, neighbor_tmp], axis=2)
        pre = jax.nn.leaky_relu(att_in @ W + b) @ v + mask       # (G, L)
        a = jax.nn.softmax(pre, axis=1) * jax.nn.softmax(weight, axis=1)
        temp = jnp.sum(neighbor_tmp * a[:, :, None], axis=1)     # (G, E)
        cur = cur.at[node[:, 0]].set(temp)
    return cur


def _gru_cell(x, h, wih, whh, bih, bhh):
    H = h.shape[-1]
    gi = x @ wih + bih
    gh = h @ whh + bhh
    r = jax.nn.sigmoid(gi[:, 0:H] + gh[:, 0:H])
    z = jax.nn.sigmoid(gi[:, H:2 * H] + gh[:, H:2 * H])
    n = jnp.tanh(gi[:, 2 * H:] + r * gh[:, 2 * H:])
    return (1.0 - z) * n + z * h


def attention_layer(emb, p2c_parent, p2c_children, p2c_mask,
                    c2p_parents, c2p_child, c2p_mask, W, b, v, gru):
    # reference aliases W_tmp = W_emb (mutated in place); every read sees `cur`.
    cur = emb
    for parents, children, mask in zip(p2c_parent, p2c_children, p2c_mask):
        parents_tmp = cur[parents]        # (G, L, E)
        children_tmp = cur[children]      # (G, L, E)
        att_in = jnp.concatenate([parents_tmp, children_tmp], axis=2)
        pre = jax.nn.leaky_relu(att_in @ W + b) @ v + mask
        a = jax.nn.softmax(pre, axis=1)
        temp = jnp.sum(children_tmp * a[:, :, None], axis=1)
        temp = (temp + parents_tmp[:, 0, :]) / 2.0
        cur = cur.at[parents[:, 0]].set(temp)

    wih, whh, bih, bhh = gru
    for parents, children, _mask in zip(c2p_parents, c2p_child, c2p_mask):
        parents_tmp = cur[parents]        # (G, L, E)
        children_tmp = cur[children]      # (G, L, E)
        seq = jnp.transpose(parents_tmp, (1, 0, 2))   # (L, G, E) — seq-first GRU
        h0 = jnp.zeros((seq.shape[1], whh.shape[0]), jnp.float32)

        def step(h, x):
            hn = _gru_cell(x, h, wih, whh, bih, bhh)
            return hn, hn

        _, outs = jax.lax.scan(step, h0, seq)
        out = (outs[-1] + children_tmp[:, 0, :]) / 2.0
        cur = cur.at[children[:, 0]].set(out)
    return cur


# ------------------------------- CoDMO forward ------------------------------

def codmo_forward(params, structs, cfg, x_diag, mask_diag, code_mask_diag,
                  x_proc, mask_proc, code_mask_proc):
    p = params
    emb_diag = leaf_attention(p['W_emb_diag'], *structs['leaf_diag'],
                              p['leaf1_W'], p['leaf1_b'], p['leaf1_v'])
    emb_proc = leaf_attention(p['W_emb_proc'], *structs['leaf_proc'],
                              p['leaf1_W'], p['leaf1_b'], p['leaf1_v'])
    emb_diag2 = attention_layer(emb_diag, *structs['tree_diag'],
                                p['att_W'], p['att_b'], p['att_v'], p['att_gru'])
    emb_proc2 = attention_layer(emb_proc, *structs['tree_proc'],
                                p['att_W'], p['att_b'], p['att_v'], p['att_gru'])
    emb_diag3 = leaf_attention(emb_diag2, *structs['leaf_diag'],
                               p['leaf2_W'], p['leaf2_b'], p['leaf2_v'])
    emb_proc3 = leaf_attention(emb_proc2, *structs['leaf_proc'],
                               p['leaf2_W'], p['leaf2_b'], p['leaf2_v'])
    # In the reference, Attention mutates its input in place (W_tmp = W_emb), so
    # emb_diag and emb_diag2 are the same (mutated) tensor when summed:
    embList_diag = 2.0 * emb_diag2 + emb_diag3
    embList_proc = 2.0 * emb_proc2 + emb_proc3

    Nd = cfg['inputDimSize_diag']
    Np = cfg['inputDimSize_proc']
    # per-visit code aggregation + tanh (Pallas, V-tiled MXU formulation)
    x_emb_diag = visit_embeddings(embList_diag[:Nd], x_diag, code_mask_diag)   # (T,B,E)
    x_emb_proc = visit_embeddings(embList_proc[:Np], x_proc, code_mask_proc)

    # per-prefix bidirectional GRUs (Pallas; dropout_rate = 0.0 -> identity).
    # The concatenated-input GRU takes the two slabs separately (W_ih split by
    # rows) -> no HBM-materialized x_emb_cat.
    hidden_diag = bigru_prefix(x_emb_diag, p['gru_diag'])
    hidden_proc = bigru_prefix(x_emb_proc, p['gru_proc'])
    hidden_cat = bigru_prefix([x_emb_diag, x_emb_proc], p['gru_cat'])

    # attention fusion + output heads (Pallas, single fused row-tiled kernel)
    y_diag, y_proc = fusion_outputs(x_emb_diag, x_emb_proc, hidden_diag,
                                    hidden_proc, hidden_cat,
                                    mask_diag, mask_proc, p)

    # relation matrix (Pallas, row-tiled, lane-padded)
    re = re_matrix(embList_diag[:Nd], embList_proc[:Np])
    return y_diag, y_proc, re


# ---------------------------- deterministic setup ---------------------------

def init_params(key, cfg):
    E, H, A = cfg['embDimSize'], cfg['hiddenDimSize'], cfg['attentionDimSize']
    assert E == H, "reference semantics require embDimSize == hiddenDimSize"
    Vd = cfg['inputDimSize_diag'] + cfg['numAncestors_diag']
    Vp = cfg['inputDimSize_proc'] + cfg['numAncestors_proc']
    Cd, Cp, dy = cfg['numClass_diag'], cfg['numClass_proc'], cfg['dim_y']

    keys = iter(jax.random.split(key, 64))
    u01 = lambda shape: jax.random.uniform(next(keys), shape, jnp.float32)
    us = lambda shape: jax.random.uniform(next(keys), shape, jnp.float32, -0.1, 0.1)

    def bidir_gru(in_dim):
        return dict(wih_f=us((in_dim, 3 * H)), whh_f=us((H, 3 * H)),
                    bih_f=us((1, 3 * H)), bhh_f=us((1, 3 * H)),
                    wih_b=us((in_dim, 3 * H)), whh_b=us((H, 3 * H)),
                    bih_b=us((1, 3 * H)), bhh_b=us((1, 3 * H)))

    return dict(
        W_emb_diag=u01((Vd, E)), W_emb_proc=u01((Vp, E)),
        leaf1_W=u01((2 * E, A)), leaf1_b=jnp.zeros((A,), jnp.float32), leaf1_v=u01((A,)),
        leaf2_W=u01((2 * E, A)), leaf2_b=jnp.zeros((A,), jnp.float32), leaf2_v=u01((A,)),
        att_W=u01((2 * E, A)), att_b=jnp.zeros((A,), jnp.float32), att_v=u01((A,)),
        att_gru=(us((E, 3 * E)), us((E, 3 * E)), us((3 * E,)), us((3 * E,))),
        gru_diag=bidir_gru(E), gru_proc=bidir_gru(E), gru_cat=bidir_gru(2 * E),
        W_output_diag=u01((2 * H, Cd)), b_output_diag=jnp.zeros((Cd,), jnp.float32),
        W_output_proc=u01((2 * H + dy, Cp)), b_output_proc=jnp.zeros((Cp,), jnp.float32),
        W_y=u01((Cd, dy)), b_y=jnp.zeros((dy,), jnp.float32),
        W_attention=u01((E + 2 * H, A)), b_attention=jnp.zeros((A,), jnp.float32),
        v_attention=u01((A,)),
    )


def make_structs(rng, cfg):
    Vd = cfg['inputDimSize_diag'] + cfg['numAncestors_diag']
    Vp = cfg['inputDimSize_proc'] + cfg['numAncestors_proc']

    def leaf_levels(node_id_lists, L_list, table_size):
        nodes, neighbors, masks, weights = [], [], [], []
        for ids, L in zip(node_id_lists, L_list):
            G = len(ids)
            nodes.append(jnp.asarray(np.tile(np.asarray(ids, np.int32)[:, None], (1, L))))
            neighbors.append(jnp.asarray(rng.integers(0, table_size, (G, L)).astype(np.int32)))
            masks.append(jnp.zeros((G, L), jnp.float32))
            weights.append(jnp.asarray(rng.random((G, L)).astype(np.float32)))
        return nodes, neighbors, masks, weights

    def tree_levels(target_id_lists, L_list, table_size, targets_first):
        a_list, b_list, m_list = [], [], []
        for ids, L in zip(target_id_lists, L_list):
            G = len(ids)
            tgt = np.tile(np.asarray(ids, np.int32)[:, None], (1, L))
            other = rng.integers(0, table_size, (G, L)).astype(np.int32)
            first, second = (tgt, other) if targets_first else (other, tgt)
            a_list.append(jnp.asarray(first))
            b_list.append(jnp.asarray(second))
            m_list.append(jnp.zeros((G, L), jnp.float32))
        return a_list, b_list, m_list

    leaf_diag = leaf_levels([[0, 1, 2, 3, 4, 5], [6, 7, 8, 9]], [4, 3], Vd)
    leaf_proc = leaf_levels([[0, 1, 2, 3], [4, 5, 6]], [4, 3], Vp)

    # parent->child levels: update target = parents[:, 0] (ancestor range ids)
    p2c_diag = tree_levels([[12, 13, 14], [15]], [4, 3], Vd, targets_first=True)
    p2c_proc = tree_levels([[10, 11, 12], [13, 14]], [4, 3], Vp, targets_first=True)
    # child->parent levels: update target = children[:, 0] (leaf ids)
    c2p_diag = tree_levels([[2, 5, 7, 9]], [3], Vd, targets_first=False)
    c2p_proc = tree_levels([[1, 4, 8]], [3], Vp, targets_first=False)

    return dict(
        leaf_diag=leaf_diag, leaf_proc=leaf_proc,
        tree_diag=(p2c_diag[0], p2c_diag[1], p2c_diag[2],
                   c2p_diag[1], c2p_diag[0], c2p_diag[2]),
        tree_proc=(p2c_proc[0], p2c_proc[1], p2c_proc[2],
                   c2p_proc[1], c2p_proc[0], c2p_proc[2]),
    )


if __name__ == "__main__":
    cfg = dict(inputDimSize_diag=12, numAncestors_diag=4, numClass_diag=12,
               inputDimSize_proc=10, numAncestors_proc=6, numClass_proc=10,
               embDimSize=32, hiddenDimSize=32, attentionDimSize=16,
               dim_y=8, dropout_rate=0.0, T=8, B=2, C=3)

    root = jax.random.PRNGKey(0)
    k_params, k_in = jax.random.split(root)
    params = init_params(k_params, cfg)
    structs = make_structs(np.random.default_rng(0), cfg)

    T, B, C = cfg['T'], cfg['B'], cfg['C']
    ks = jax.random.split(k_in, 6)
    x_diag = jax.random.randint(ks[0], (T, B, C), 0, cfg['inputDimSize_diag'], jnp.int32)
    code_mask_diag = jax.random.uniform(ks[1], (T, B, C), jnp.float32)
    mask_diag = (jax.random.uniform(ks[2], (T, B)) > 0.2).astype(jnp.float32)
    x_proc = jax.random.randint(ks[3], (T, B, C), 0, cfg['inputDimSize_proc'], jnp.int32)
    code_mask_proc = jax.random.uniform(ks[4], (T, B, C), jnp.float32)
    mask_proc = (jax.random.uniform(ks[5], (T, B)) > 0.2).astype(jnp.float32)

    y_diag, y_proc, re = codmo_forward(params, structs, cfg,
                                       x_diag, mask_diag, code_mask_diag,
                                       x_proc, mask_proc, code_mask_proc)
    jax.block_until_ready((y_diag, y_proc, re))

    assert y_diag.shape == (T, B, cfg['numClass_diag'])
    assert y_proc.shape == (T, B, cfg['numClass_proc'])
    assert re.shape == (cfg['inputDimSize_diag'], cfg['inputDimSize_proc'])
    assert jnp.all(jnp.isfinite(y_diag)) and jnp.all(jnp.isfinite(y_proc))
    assert jnp.all(jnp.isfinite(re))
    print("KERNEL_OK")
</pallas_src>

<mosaic_0001>
module attributes {stable_mosaic.version = 11 : i64} {
  func.func @_visit_emb_kernel(%arg0: i32, %arg1: i32, %arg2: memref<8x3xi32, #tpu.memory_space<vmem>>, %arg3: memref<8x3xf32, #tpu.memory_space<vmem>>, %arg4: memref<12x32xf32, #tpu.memory_space<vmem>>, %arg5: memref<8x32xf32, #tpu.memory_space<vmem>>, %arg6: memref<8x32xf32, #tpu.memory_space<vmem>>) attributes {dimension_semantics = [#tpu.dimension_semantics<parallel>, #tpu.dimension_semantics<arbitrary>], iteration_bounds = array<i64: 2, 1>, scalar_prefetch = 0 : i64, scratch_operands = 1 : i64, tpu.core_type = #tpu.core_type<tc>, window_params = [{transform_indices = @transform_0, window_bounds = array<i64: 8, 3>}, {transform_indices = @transform_1, window_bounds = array<i64: 8, 3>}, {transform_indices = @transform_2, window_bounds = array<i64: 12, 32>}, {transform_indices = @transform_3, window_bounds = array<i64: 8, 32>}]} {
    %c0_i32 = arith.constant 0 : i32
    %0 = arith.cmpi eq, %arg1, %c0_i32 : i32
    %1 = arith.extui %0 : i1 to i32
    %c0_i32_0 = arith.constant 0 : i32
    %2 = arith.cmpi ne, %1, %c0_i32_0 : i32
    scf.if %2 {
      %cst_16 = arith.constant 0.000000e+00 : f32
      %45 = vector.broadcast %cst_16 : f32 to vector<8x32xf32>
      %c0_17 = arith.constant 0 : index
      %c0_18 = arith.constant 0 : index
      %46 = vector.load %arg6[%c0_17, %c0_18] : memref<8x32xf32, #tpu.memory_space<vmem>>, vector<8x32xf32>
      tpu.vector_store %arg6[%c0_17, %c0_18], %45 {strides = array<i32>} : memref<8x32xf32, #tpu.memory_space<vmem>>, vector<8x32xf32>,
    } else {
    }
    %c0 = arith.constant 0 : index
    %c0_1 = arith.constant 0 : index
    %3 = vector.load %arg2[%c0, %c0_1] : memref<8x3xi32, #tpu.memory_space<vmem>>, vector<8x3xi32>
    %c0_2 = arith.constant 0 : index
    %c0_3 = arith.constant 0 : index
    %4 = vector.load %arg3[%c0_2, %c0_3] : memref<8x3xf32, #tpu.memory_space<vmem>>, vector<8x3xf32>
    %5 = tpu.iota {dimensions = array<i32: 1>} : vector<8x12xi32>
    %c12_i32 = arith.constant 12 : i32
    %6 = arith.muli %arg1, %c12_i32 : i32
    %7 = vector.broadcast %6 : i32 to vector<8x12xi32>
    %8 = arith.addi %5, %7 : vector<8x12xi32>
    %cst = arith.constant 0.000000e+00 : f32
    %9 = vector.broadcast %cst : f32 to vector<8x12xf32>
    %10 = vector.extract_strided_slice %3 {offsets = [0, 0], sizes = [8, 1], strides = [1, 1]} : vector<8x3xi32> to vector<8x1xi32>
    %11 = vector.broadcast %10 : vector<8x1xi32> to vector<8x12xi32>
    %12 = arith.cmpi eq, %8, %11 : vector<8x12xi32>
    %13 = vector.extract_strided_slice %4 {offsets = [0, 0], sizes = [8, 1], strides = [1, 1]} : vector<8x3xf32> to vector<8x1xf32>
    %cst_4 = arith.constant 0.000000e+00 : f32
    %14 = vector.shape_cast %13 : vector<8x1xf32> to vector<8x1xf32>
    %15 = vector.broadcast %14 : vector<8x1xf32> to vector<8x12xf32>
    %16 = vector.broadcast %cst_4 : f32 to vector<8x12xf32>
    %17 = arith.select %12, %15, %16 : vector<8x12xi1>, vector<8x12xf32>
    %18 = arith.addf %9, %17 : vector<8x12xf32>
    %19 = vector.extract_strided_slice %3 {offsets = [0, 1], sizes = [8, 1], strides = [1, 1]} : vector<8x3xi32> to vector<8x1xi32>
    %20 = vector.broadcast %19 : vector<8x1xi32> to vector<8x12xi32>
    %21 = arith.cmpi eq, %8, %20 : vector<8x12xi32>
    %22 = vector.extract_strided_slice %4 {offsets = [0, 1], sizes = [8, 1], strides = [1, 1]} : vector<8x3xf32> to vector<8x1xf32>
    %cst_5 = arith.constant 0.000000e+00 : f32
    %23 = vector.shape_cast %22 : vector<8x1xf32> to vector<8x1xf32>
    %24 = vector.broadcast %23 : vector<8x1xf32> to vector<8x12xf32>
    %25 = vector.broadcast %cst_5 : f32 to vector<8x12xf32>
    %26 = arith.select %21, %24, %25 : vector<8x12xi1>, vector<8x12xf32>
    %27 = arith.addf %18, %26 : vector<8x12xf32>
    %28 = vector.extract_strided_slice %3 {offsets = [0, 2], sizes = [8, 1], strides = [1, 1]} : vector<8x3xi32> to vector<8x1xi32>
    %29 = vector.broadcast %28 : vector<8x1xi32> to vector<8x12xi32>
    %30 = arith.cmpi eq, %8, %29 : vector<8x12xi32>
    %31 = vector.extract_strided_slice %4 {offsets = [0, 2], sizes = [8, 1], strides = [1, 1]} : vector<8x3xf32> to vector<8x1xf32>
    %cst_6 = arith.constant 0.000000e+00 : f32
    %32 = vector.shape_cast %31 : vector<8x1xf32> to vector<8x1xf32>
    %33 = vector.broadcast %32 : vector<8x1xf32> to vector<8x12xf32>
    %34 = vector.broadcast %cst_6 : f32 to vector<8x12xf32>
    %35 = arith.select %30, %33, %34 : vector<8x12xi1>, vector<8x12xf32>
    %36 = arith.addf %27, %35 : vector<8x12xf32>
    %c0_7 = arith.constant 0 : index
    %c0_8 = arith.constant 0 : index
    %37 = vector.load %arg6[%c0_7, %c0_8] : memref<8x32xf32, #tpu.memory_space<vmem>>, vector<8x32xf32>
    %c0_9 = arith.constant 0 : index
    %c0_10 = arith.constant 0 : index
    %38 = vector.load %arg4[%c0_9, %c0_10] : memref<12x32xf32, #tpu.memory_space<vmem>>, vector<12x32xf32>
    %cst_11 = arith.constant dense<0.000000e+00> : vector<8x32xf32>
    %39 = tpu.matmul %36, %38, %cst_11 {dimension_numbers = #tpu.dot_dimension_numbers<[1], [0], [0], [1], [0, 0, 1, 1], [], []>} : vector<8x12xf32>, vector<12x32xf32>, vector<8x32xf32> -> vector<8x32xf32>
    %40 = arith.addf %37, %39 : vector<8x32xf32>
    %c0_12 = arith.constant 0 : index
    %c0_13 = arith.constant 0 : index
    %41 = vector.load %arg6[%c0_12, %c0_13] : memref<8x32xf32, #tpu.memory_space<vmem>>, vector<8x32xf32>
    tpu.vector_store %arg6[%c0_12, %c0_13], %40 {strides = array<i32>} : memref<8x32xf32, #tpu.memory_space<vmem>>, vector<8x32xf32>,
    %c0_i32_14 = arith.constant 0 : i32
    %42 = arith.cmpi eq, %arg1, %c0_i32_14 : i32
    %43 = arith.extui %42 : i1 to i32
    %c0_i32_15 = arith.constant 0 : i32
    %44 = arith.cmpi ne, %43, %c0_i32_15 : i32
    scf.if %44 {
      %c0_16 = arith.constant 0 : index
      %c0_17 = arith.constant 0 : index
      %45 = vector.load %arg6[%c0_16, %c0_17] : memref<8x32xf32, #tpu.memory_space<vmem>>, vector<8x32xf32>
      %46 = math.tanh %45 : vector<8x32xf32>
      %c0_18 = arith.constant 0 : index
      %c0_19 = arith.constant 0 : index
      %47 = vector.load %arg5[%c0_18, %c0_19] : memref<8x32xf32, #tpu.memory_space<vmem>>, vector<8x32xf32>
      tpu.vector_store %arg5[%c0_18, %c0_19], %46 {strides = array<i32>} : memref<8x32xf32, #tpu.memory_space<vmem>>, vector<8x32xf32>,
    } else {
    }
    return
  }
  func.func @transform_0(%arg0: i32, %arg1: i32) -> (i32, i32) {
    %c0_i32 = arith.constant 0 : i32
    %c0_i32_0 = arith.constant 0 : i32
    return %arg0, %c0_i32 : i32, i32
  }
  func.func @transform_1(%arg0: i32, %arg1: i32) -> (i32, i32) {
    %c0_i32 = arith.constant 0 : i32
    %c0_i32_0 = arith.constant 0 : i32
    return %arg0, %c0_i32 : i32, i32
  }
  func.func @transform_2(%arg0: i32, %arg1: i32) -> (i32, i32) {
    %c0_i32 = arith.constant 0 : i32
    %c0_i32_0 = arith.constant 0 : i32
    return %arg1, %c0_i32 : i32, i32
  }
  func.func @transform_3(%arg0: i32, %arg1: i32) -> (i32, i32) {
    %c0_i32 = arith.constant 0 : i32
    %c0_i32_0 = arith.constant 0 : i32
    return %arg0, %c0_i32 : i32, i32
  }
}

</mosaic_0001>

<bundles_post_ra>
// kernel: tpu_custom_call.1
= control target key start
LH: loop header
LB: loop body
LE: loop exit
PB: predicated region body
PF: predicated region fallthrough
CT: control target
= control target key end

     0   :  { %8 = vsyncpa [#allocation4], 0  ;;  %s790_s0 = inlined_call_operand.vmem [shape: s32[16,3], index: 0, kind: input, shape index: {}]   ;;  %s791_s1 = inlined_call_operand.vmem [shape: f32[16,3], index: 1, kind: input, shape index: {}]   ;;  %s792_s2 = inlined_call_operand.vmem [shape: f32[12,32], index: 2, kind: input, shape index: {}]   ;;  %s793_s3 = inlined_call_operand.hbm [shape: f32[16,32], index: 3, kind: output, shape index: {}]  }
   0x1   :  { %10 = vsyncpa [#allocation4 + $0x1], 0  ;;  %s666_s12 = smov 0   ;;  %s668_s13 = smov 0  }
   0x2   :  { %s670_s14 = smov 0   ;;  %s672_s15 = smov 0  }
   0x3   :  { %s674_s16 = smov 0   ;;  %s676_s17 = smov 0  }
   0x4 LB: > { %s459_s18 = sadd.s32 4294967295, %s636_s17   ;;  %s460_s19 = sadd.s32 4294967294, %s636_s17   ;;  %s636_s17 = sphi %s676_s17, %s16_s17   ;;  %s632_s16 = sphi %s674_s16, %s800_s16   ;;  %s628_s15 = sphi %s672_s15, %s799_s15   ;;  %s624_s14 = sphi %s670_s14, %s798_s14   ;;  %s620_s13 = sphi %s668_s13, %s797_s13   ;;  %s616_s12 = sphi %s666_s12, %s796_s12  }
   0x5   : > { %s28_s20 = sadd.s32 1, %s632_s16  ;;  %s113_s21 = sadd.s32 1, %s624_s14 }
   0x6   : > { %p30_p0 = scmp.ge.s32.totalorder %s28_s20, 2  ;;  %p123_p1 = scmp.ne.s32.totalorder %s624_s14, %s620_s13 }
   0x7   : > { %p124_p2 = scmp.eq.s32.totalorder %s459_s18, 1  ;;  %p129_p3 = scmp.ne.s32.totalorder %s620_s13, %s616_s12 }
   0x8   : > { %s802_s20 = smov (%p30_p0, %s28_s20), 0  ;;  %p130_p5 = scmp.eq.s32.totalorder %s460_s19, 1 }
   0x9   : > { %p706_p4 = por %p124_p2, %p123_p1  ;;  %s110_s23 = ssub.s32 %s632_s16, %s802_s20 }
   0xa   : > { %p464_p6 = scmp.ge.s32.totalorder %s636_s17, 1  ;;  %p111_p7 = scmp.eq.s32.totalorder %s110_s23, 0 }
   0xb   : > { %p713_p8 = por %p130_p5, %p129_p3  ;;  %p171_p9 = scmp.lt.s32.totalorder %s636_s17, 3 }
   0xc   : > { %s719_s25 = scalar_select %p111_p7, %s624_s14, %s113_s21  }
   0xd   : > { %p172_p10 = pnand %p464_p6, %p171_p9 }
   0xe   : > { %p203_p11 = scmp.lt.s32.totalorder (!%p172_p10), %s628_s15, 1  ;;  %v638_v0 = vmov (!%p172_p10), 0   ;;  %v639_v3 = vmov (!%p172_p10), 1   ;;  %v262_v4 = vld [vmem:[%s792_s2] sm:$0xff] (!%p172_p10)  ;;  %v263_v5 = vld [vmem:[%s792_s2 + $0x8] sm:$0xf] (!%p172_p10)  ;;  %v225_v10 = vlaneseq (!%p172_p10) }
   0xf   : > { %175 = sbr.rel (%p172_p10) target bundleno = 416 (0x1a0), region = 32  ;;  %552 = vset.pattern.permute.xlu1 (!%p172_p10), %v638_v0  ;;  %550 = vset.pattern.permute.xlu0 (!%p172_p10), %v638_v0  ;;  %v640_v6 = vmov (!%p172_p10), 2   ;;  %vm268_vm0 = vcmask (!%p172_p10), 1043456   ;;  %v485_v7 = vpack.c.bf16 (!%p172_p10), %v263_v5, %v262_v4  ;;  %vm641_vm1 = vmmov (!%p172_p10), 1   ;;  %s200_s11 = sand.u32 (!%p172_p10), 1, %s620_s13  }
  0x10   : > { %vm486_vm2 = vmpackc.low (!%p172_p10), %vm268_vm0, %vm641_vm1  ;;  %v642_v8 = vmov (!%p172_p10), 0.0|0.0   ;;  %vm221_vm3 = vcmask (!%p172_p10), 261120   ;;  %v643_v9 = vmov (!%p172_p10), 0.0   ;;  %vm644_vm4 = vmmov (!%p172_p10), 0   ;;  %s465_s18 = sshll.u32 (!%p172_p10), %s200_s11, 3  ;;  %s471_s19 = sshll.u32 (!%p172_p10), %s628_s15, 7 }
  0x11   : > { %484 = vmatprep.subr.bf16.mxu0 (!%p172_p10), %v642_v8  ;;  %222 = vst.msk [vmem:[#allocation2] sm:$0xff] (!%p172_p10), %vm221_vm3, %v643_v9  ;;  %481 = vmatprep.mubr.msk.f32.mxu0 (!%p172_p10), %vm644_vm4, %v643_v9  ;;  %v226_v13 = vand.u32 (!%p172_p10), 127, %v225_v10  ;;  %vm264_vm8 = vcmask (!%p172_p10), 97280   ;;  %s202_s21 = scalar_lea.vmem (!%p172_p10), [#allocation3], %s465_s18  ;;  %s742_s28 = scalar_lea.hbm (!%p172_p10), %s793_s3, %s471_s19 }
  0x12   : > { %487 = vmatpush3.bf16.msk.msra.mxu0 (!%p172_p10), %vm486_vm2, %v485_v7  ;;  %s365_s23 = sshll.u32 (!%p172_p10), %s202_s21, 4  ;;  %s352_s29 = scalar_lea.sflag (!%p172_p10), [#allocation4], %s200_s11  ;;  %s744_s23 = int_to_ptr.vmem [resolvable:$true] %s365_s23 }
  0x16   : > { %s204_s26 = scalar_select %p203_p11, %s628_s15, 1 }
  0x17   : > { %s645_s15 = smov [#allocation3]  }
  0x18   : > { %s466_s27 = sshll.u32 %s204_s26, 3  ;;  %v261_v23 = vld [vmem:[#allocation2] sm:$0xff]  ;;  %s562_s4 = sshll.u32 %s645_s15, 4  ;;  %s563_s4 = int_to_ptr.vmem [resolvable:$false] %s562_s4 }
  0x19   : > { %s210_s30 = scalar_lea.vmem %s791_s1, %s466_s27  ;;  %s206_s6 = scalar_lea.vmem %s790_s0, %s466_s27 }
  0x1a   : > { %v224_v1 = vld [vmem:[%s210_s30] sm:$0xff]  ;;  %s558_s30 = scalar_lea.vmem %s744_s23, 128  ;;  %s564_s5 = scalar_lea.vmem %s563_s4, 256 }
  0x1b   : > { %v223_v2 = vld [vmem:[%s206_s6] sm:$0xff]  ;;  %236 = vperm.xlu1 %552, %v224_v1   ;;  %p559_p12 = scmp.ne.s32.totalorder %s744_s23, %s558_s30  ;;  %p565_p1 = scmp.lt.s32.totalorder %s744_s23, %s563_s4 }
  0x1c   : > { %231 = vperm.xlu0 %550, %v223_v2   ;;  %p566_p2 = scmp.lt.s32.totalorder %s564_s5, %s558_s30 }
  0x1d   : > { %p560_p13 = pnand %p559_p12, %p706_p4 }
  0x1e   : > { %p567_p3 = por %p566_p2, %p565_p1 }
  0x1f   : > { %553 = vset.pattern.permute.xlu1 %v639_v3  ;;  %p561_p0 = pneg %p560_p13 }
  0x20   : > { %551 = vset.pattern.permute.xlu0 %v639_v3  ;;  %246 = vperm.xlu1 %553, %v224_v1  }
  0x21   : > { %242 = vperm.xlu0 %551, %v223_v2   ;;  %p568_p5 = pnand %p567_p3, %p561_p0 }
  0x24   : > { %554 = vset.pattern.permute.xlu1 %v640_v6 }
  0x25   : > { %555 = vset.pattern.permute.xlu0 %v640_v6  ;;  %252 = vperm.xlu1 %554, %v223_v2  }
  0x26   : > { %256 = vperm.xlu0 %555, %v224_v1  }
  0x9a   : > { %v237_v11 = vpop.permute.xlu1 %236 }
  0x9b   : > { %v232_v12 = vpop.permute.xlu0 %231 }
  0x9c   : > { %vm233_vm6 = vcmp.eq.s32.totalorder %v226_v13, %v232_v12 }
  0x9d   : > { %v239_v17 = vsel %vm233_vm6, %v237_v11, 0.0 }
  0x9f   : > { %v247_v14 = vpop.permute.xlu1 %246 }
  0xa0   : > { %v243_v15 = vpop.permute.xlu0 %242 }
  0xa1   : > { %vm244_vm5 = vcmp.eq.s32.totalorder %v226_v13, %v243_v15 }
  0xa2   : > { %v249_v16 = vsel %vm244_vm5, %v247_v14, 0.0 }
  0xa3   : > { %v250_v20 = vadd.f32 %v249_v16, %v239_v17 }
  0xa4   : > { %v253_v18 = vpop.permute.xlu1 %252 }
  0xa5   : > { %v257_v19 = vpop.permute.xlu0 %256  ;;  %vm254_vm7 = vcmp.eq.s32.totalorder %v226_v13, %v253_v18 }
  0xa6   : > { %v259_v21 = vsel %vm254_vm7, %v257_v19, 0.0 }
  0xa7   : > { %v260_v22 = vadd.f32 %v259_v21, %v250_v20 }
  0xa9   : > { %482 = vmatmul.mubr.msk.f32.vlgmr.msra.gmra.mrb[0].mxu0 %vm264_vm8, %v260_v22 }
 0x17c   : > { %v338_v24 = vpop.f32.mrb[0].mxu0 }
 0x17d   : > { %v342_v25 = vadd.f32 %v338_v24, %v261_v23  ;;  %v483_v26 = vpop.f32.mrb[1].mxu0 }
 0x17f   : > { %344 = vst.msk [vmem:[#allocation2] sm:$0xff] %vm221_vm3, %v342_v25 }
 0x186   : > { %v348_v27 = vld [vmem:[#allocation2] sm:$0xff] }
 0x187   : > { %556 = vtanh.f32 %v348_v27 }
 0x191   : > { %v557_v28 = vpop.eup %556 }
 0x192   : > { %350 = vst.msk [vmem:[%s202_s21] sm:$0xff] %vm221_vm3, %v557_v28 }
 0x193   : > { %571 = shalt.err (!%p568_p5)
}
 0x194   : > { %s572_s6 = scalar_lea.hbm %s742_s28, 128  ;;  %s576_s9 = scalar_lea.hbm %s793_s3, 256 }
 0x195   : > { %p573_p6 = scmp.ne.s32.totalorder %s742_s28, %s572_s6  ;;  %p577_p10 = scmp.lt.u32.totalorder %s742_s28, %s793_s3 }
 0x196   : > { %p578_p11 = scmp.lt.u32.totalorder %s576_s9, %s572_s6  ;;  %p580_p13 = scmp.lt.u32.totalorder %s572_s6, %s742_s28 }
 0x197   : > { %p574_p7 = pnand %p573_p6, %p706_p4 }
 0x198   : > { %p579_p12 = por %p578_p11, %p577_p10 }
 0x199   : > { %p575_p9 = pneg %p574_p7 }
 0x19a   : > { %p581_p0 = por %p580_p13, %p579_p12 }
 0x19c   : > { %p582_p1 = pnand %p581_p0, %p575_p9 }
 0x19e   : > { %585 = shalt.err (!%p582_p1)
}
 0x19f   : > { %488 = dma.vmem_to_hbm [thread:$0]  (%p706_p4), %s744_s23, 128, %s742_s28, %s352_s29  }
 0x1a0 PF: > { %p494_p2 = scmp.ge.s32.totalorder %s636_s17, 2  ;;  %s377_s18 = sand.u32 1, %s616_s12  }
 0x1a1   : > { %s378_s19 = scalar_lea.sflag [#allocation4], %s377_s18 }
 0x1a2   : > { %p491_p3 = pnand %p494_p2, %p713_p8 }
 0x1a4   : > { %611 = dma.done.wait (!%p491_p3), %s378_s19, 128  }
 0x1a5   : > { %613 = vsyncadd (!%p491_p3), %s378_s19, 4294967168  ;;  %s16_s17 = sadd.s32 1, %s636_s17   ;;  %s796_s12 = smov %s620_s13 }
 0x1a6   : > { %p13_p5 = scmp.ge.s32.totalorder %s16_s17, 4   ;;  %s797_s13 = smov %s624_s14 }
 0x1a7   : > { %s798_s14 = smov %s719_s25  ;;  %s799_s15 = smov %s632_s16 }
 0x1a8   : > { %s800_s16 = smov %s802_s20  ;;  %15 = sbr.rel (!%p13_p5) target bundleno = 4 (0x4), region = 81 }
 0x1af   :  { %383 = vsyncpa [#allocation4], 1 }
 0x1b0   :  { %385 = vsyncpa [#allocation4 + $0x1], 1 }

</bundles_post_ra>
